<compile_context>
chip_gen: v5e
topology: v5e:2x2
jax: 0.10.0
libtpu: 0.0.40
codegen_flags: <defaults>
</compile_context>

<pallas_src>
import functools

import jax
import jax.numpy as jnp
from jax.experimental import pallas as pl
from jax.experimental.pallas import tpu as pltpu

_MB = 1024 * 1024


def _round_up(x, m):
    return (x + m - 1) // m * m


def _cdiv(a, b):
    return (a + b - 1) // b


def _pad_axis(a, axis, target):
    pad = target - a.shape[axis]
    if pad <= 0:
        return a
    widths = [(0, 0)] * a.ndim
    widths[axis] = (0, pad)
    return jnp.pad(a, widths)


def _tile_candidates(padded_dim, max_tile=None):
    """Multiples of 128 that exactly divide `padded_dim`, descending."""
    cands = [d for d in range(padded_dim, 0, -128)
             if padded_dim % d == 0 and (max_tile is None or d <= max_tile)]
    return cands or [128]


@functools.lru_cache(maxsize=1)
def _tpu_config():
    """Returns (vmem_capacity_bytes, has_two_tensorcores, prefers_256_wide_tiles)."""
    kind = ""
    try:
        kind = jax.devices()[0].device_kind.lower()
    except Exception:
        pass
    vmem_cap = None
    try:
        vmem_cap = int(pltpu.get_tpu_info().vmem_capacity_bytes)
    except Exception:
        vmem_cap = None
    if vmem_cap is None:
        if "7" in kind:
            vmem_cap = 64 * _MB          # v7x: 64 MiB per TensorCore
        elif ("v5" in kind) or ("v6" in kind):
            vmem_cap = 128 * _MB         # v5e / v6e
        else:
            vmem_cap = 32 * _MB          # conservative default for unknown chips
    two_tc = "7" in kind                 # v7x: 2 TCs sharded over parallel grid axes
    prefer_256 = not any(t in kind for t in ("v2", "v3", "v4", "v5"))  # 2x256x256 MXU
    return vmem_cap, two_tc, prefer_256


def _vmem_bytes(TM, TN, TK, nt, kt, in_itemsize, out_itemsize):
    """Working-set estimate for one grid step (incl. pipeline double buffers)."""
    w_bufs = 1 if (nt == 1 and kt == 1) else 2   # single resident copy when grid-invariant
    b_bufs = 1 if nt == 1 else 2
    total = 2 * TM * TK * in_itemsize            # x tile (double-buffered)
    total += w_bufs * TN * TK * in_itemsize      # weight
    total += b_bufs * TN * 4                     # bias (f32)
    total += 2 * TM * TN * out_itemsize          # output tile (double-buffered)
    if kt > 1:
        total += TM * TN * 4                     # f32 accumulator scratch
    return total


def _linear_block_kernel(x_ref, w_ref, b_ref, o_ref, *scratch,
                         activation: bool, kt: int, precision):
    # x_ref: (TM, TK); w_ref: (TK, TN)  -- weight pre-transposed to (K, N) in the
    # wrapper, so the MXU contraction needs no per-step transpose;
    # b_ref: (1, TN) f32; o_ref: (TM, TN).
    part = jnp.dot(x_ref[...], w_ref[...],
                   preferred_element_type=jnp.float32, precision=precision)
    if kt == 1:
        # Single K step: fuse bias + ReLU, no accumulator round-trip.
        out = part + b_ref[...]
        if activation:
            out = jnp.maximum(out, 0.0)
        o_ref[...] = out.astype(o_ref.dtype)
    else:
        acc_ref = scratch[0]
        k = pl.program_id(2)

        @pl.when(k == 0)
        def _():
            acc_ref[...] = jnp.zeros_like(acc_ref)

        acc_ref[...] += part

        @pl.when(k == kt - 1)
        def _():
            out = acc_ref[...] + b_ref[...]
            if activation:
                out = jnp.maximum(out, 0.0)
            o_ref[...] = out.astype(o_ref.dtype)


def prepare_linear_block_params(weight, bias, *, compute_dtype=None):
    """One-time (hoisted) param prep: optional cast, transpose to (K, N), pad to
    lane multiples.  Call at init / param-load time, NOT per forward call."""
    n_out, n_in = weight.shape
    if compute_dtype is not None:
        weight = weight.astype(compute_dtype)
    k_pad = _round_up(n_in, 128)
    n_pad = _round_up(n_out, 128)
    w_kn = _pad_axis(_pad_axis(jnp.transpose(weight), 0, k_pad), 1, n_pad)  # (K_pad, N_pad)
    b_row = _pad_axis(bias.astype(jnp.float32).reshape(1, n_out), 1, n_pad)  # (1, N_pad)
    return {"w": w_kn, "b": b_row, "n_in": n_in, "n_out": n_out}


def linear_block_apply(x, params, *, activation=True, precision=None,
                       use_pallas=None, tile_m_max=2048,
                       max_tile_k=None, max_tile_n=None):
    """Hot path: relu(x @ W.T + b) with prepared params (see prepare_linear_block_params)."""
    w, b = params["w"], params["b"]
    n_in, n_out = params["n_in"], params["n_out"]
    B, n_in_x = x.shape
    assert n_in_x == n_in
    k_pad, n_pad = w.shape
    out_dtype = x.dtype
    if x.dtype != w.dtype:
        x = x.astype(w.dtype)

    # Tiny problems: a pallas_call is pure fixed overhead; let XLA fuse them.
    if use_pallas is None:
        use_pallas = (B * n_out >= 128 * 128) and (n_in >= 64)
    if not use_pallas:
        out = x @ w[:n_in, :n_out] + b[0, :n_out]
        if activation:
            out = jnp.maximum(out, 0.0)
        return out.astype(out_dtype)

    in_isz = jnp.dtype(w.dtype).itemsize
    out_isz = jnp.dtype(out_dtype).itemsize
    vmem_cap, two_tc, prefer_256 = _tpu_config()
    budget = int(0.40 * vmem_cap)       # per-step working-set target
    limit_cap = int(0.72 * vmem_cap)    # leave headroom for Mosaic internal scratch/sems

    # Sublane packing: f32 -> 8-row tiles, bf16 -> 16, int8/fp8 -> 32.
    min_tm = max(8, 32 // in_isz)

    # ---- (TK, TN): prefer the whole padded weight resident in VMEM ---------
    tk_cands = _tile_candidates(k_pad, max_tile_k)
    tn_cands = _tile_candidates(n_pad, max_tile_n)
    tm_probe = B if B <= min_tm else min_tm
    combos = []
    for tk in tk_cands:
        for tn in tn_cands:
            kt_c, nt_c = k_pad // tk, n_pad // tn
            if _vmem_bytes(tm_probe, tn, tk, nt_c, kt_c, in_isz, out_isz) <= budget:
                combos.append((tk, tn, kt_c, nt_c))
    if combos:
        def _score(c):
            tk, tn, kt_c, nt_c = c
            full_k = kt_c == 1                               # no accumulator RMW
            wide_n = (not prefer_256) or tn >= 256 or tn == n_pad  # fill 256-wide MXU
            return (full_k, wide_n, tk * tn, tn)
        TK, TN, kt, nt = max(combos, key=_score)
    else:  # enormous layer: stream 128x128-granular weight tiles
        TK, TN = tk_cands[-1], tn_cands[-1]
        kt, nt = k_pad // TK, n_pad // TN

    # ---- TM: largest batch tile fitting the VMEM budget ---------------------
    if B <= min_tm:
        TM = B                                   # block == full dim: always legal
    else:
        cands = []
        if B <= tile_m_max:
            cands.append(B)                      # whole batch in one tile
        cands += [t for t in (2048, 1024, 512, 256, 128, 64, 32, 16, 8)
                  if t % min_tm == 0 and t <= min(B, tile_m_max)]
        if min_tm not in cands:
            cands.append(min_tm)
        cands = list(dict.fromkeys(cands))
        TM = cands[-1]
        for t in cands:
            if _vmem_bytes(t, TN, TK, nt, kt, in_isz, out_isz) <= budget:
                TM = t
                break
    mt = _cdiv(B, TM)

    # v7x: two TensorCores are sharded over the "parallel" grid axes -- make
    # sure there are >= 2 parallel steps so one core is not idle.
    if two_tc and mt * nt == 1:
        if B > min_tm:
            TM = max(min_tm, _round_up(_cdiv(B, 2), min_tm))
            mt = _cdiv(B, TM)
        elif TN % 256 == 0:
            TN = TN // 2
            nt = n_pad // TN

    est = _vmem_bytes(TM, TN, TK, nt, kt, in_isz, out_isz)
    vmem_limit = int(min(max(2 * est, 32 * _MB), limit_cap))

    # ---- per-call input prep -------------------------------------------------
    # Zero-pad x's contracted K axis only when n_in isn't 128-aligned; the
    # padded K columns meet zero weight rows, so the result is exact.
    xp = _pad_axis(x, 1, k_pad) if n_in != k_pad else x

    # Output stays lane-dense: no pad/slice when n_out % 128 == 0; otherwise a
    # 128-aligned padded output (unmasked vst) plus one trailing slice.
    out_cols = n_pad

    # Grid-invariant operands: one resident VMEM copy (no pipelined double buffer).
    if nt == 1 and kt == 1:
        w_spec = pl.BlockSpec(memory_space=pltpu.MemorySpace.VMEM)
    else:
        w_spec = pl.BlockSpec((TK, TN), lambda i, j, k: (k, j))
    if nt == 1:
        b_spec = pl.BlockSpec(memory_space=pltpu.MemorySpace.VMEM)
    else:
        b_spec = pl.BlockSpec((1, TN), lambda i, j, k: (0, j))

    kernel = functools.partial(_linear_block_kernel, activation=activation,
                               kt=kt, precision=precision)
    scratch_shapes = [] if kt == 1 else [pltpu.VMEM((TM, TN), jnp.float32)]

    # NOTE: when B % TM != 0 the trailing rows of the last x tile are stale
    # VMEM; they only feed output rows dropped by the masked writeback of the
    # partial output block.  Keep M a non-contracted ("parallel") axis.
    out = pl.pallas_call(
        kernel,
        out_shape=jax.ShapeDtypeStruct((B, out_cols), out_dtype),
        grid_spec=pltpu.PrefetchScalarGridSpec(
            num_scalar_prefetch=0,
            grid=(mt, nt, kt),                                    # reduction axis last
            in_specs=[
                pl.BlockSpec((TM, TK), lambda i, j, k: (i, k)),   # x tile
                w_spec,                                           # weight (K, N)
                b_spec,                                           # bias (1, N) f32
            ],
            out_specs=pl.BlockSpec((TM, TN), lambda i, j, k: (i, j)),
            scratch_shapes=scratch_shapes,
        ),
        compiler_params=pltpu.CompilerParams(
            dimension_semantics=("parallel", "parallel", "arbitrary"),
            vmem_limit_bytes=vmem_limit,
        ),
    )(xp, w, b)

    if out_cols != n_out:
        out = out[:, :n_out]
    return out


def linear_block_forward(x, weight, bias, *, activation=True, compute_dtype=None,
                         precision=None, use_pallas=None, tile_m_max=2048,
                         max_tile_k=None, max_tile_n=None):
    """LinearBlock forward (bn=False, dropout=0.0): relu(x @ weight.T + bias).

    Convenience wrapper that prepares params per call; in steady state call
    prepare_linear_block_params() once and reuse linear_block_apply().
    """
    params = prepare_linear_block_params(weight, bias, compute_dtype=compute_dtype)
    return linear_block_apply(x, params, activation=activation, precision=precision,
                              use_pallas=use_pallas, tile_m_max=tile_m_max,
                              max_tile_k=max_tile_k, max_tile_n=max_tile_n)

# TODO(synk): bn=True branch (nn.BatchNorm) and dropout>0 training-mode masking
# are not exercised by the default module config and are omitted here.


if __name__ == "__main__":
    key = jax.random.PRNGKey(0)

    def init_params(k, n_in, n_out):
        kw, kb = jax.random.split(k)
        bound = 1.0 / (n_in ** 0.5)
        w = jax.random.uniform(kw, (n_out, n_in), jnp.float32, -bound, bound)
        b = jax.random.uniform(kb, (n_out,), jnp.float32, -bound, bound)
        return w, b

    def ref_forward(x, w, b, activation=True):
        out = x @ w.T + b
        return jnp.maximum(out, 0.0) if activation else out

    # --- Test 1: small module-default shapes, Pallas path forced + XLA fallback. ---
    k1, k2, key = jax.random.split(key, 3)
    B, n_in, n_out = 8, 32, 64
    w1, b1 = init_params(k1, n_in, n_out)
    x1 = jax.random.normal(k2, (B, n_in), jnp.float32)
    out = jax.block_until_ready(linear_block_forward(x1, w1, b1, use_pallas=True))
    assert out.shape == (B, n_out)
    assert jnp.allclose(out, ref_forward(x1, w1, b1), atol=1e-4, rtol=1e-4), "tiny mismatch"
    out_fb = jax.block_until_ready(linear_block_forward(x1, w1, b1))   # auto -> XLA fallback
    assert jnp.allclose(out_fb, ref_forward(x1, w1, b1), atol=1e-4, rtol=1e-4), "fallback mismatch"

    # --- Test 2: moderate shapes; full-K/full-N resident weight (kt=nt=1),
    #             hoisted (prepared) params reused across calls. ---
    k1, k2, key = jax.random.split(key, 3)
    B, n_in, n_out = 256, 640, 384
    w2, b2 = init_params(k1, n_in, n_out)
    x2 = jax.random.normal(k2, (B, n_in), jnp.float32)
    params2 = prepare_linear_block_params(w2, b2)
    out = jax.block_until_ready(linear_block_apply(x2, params2))
    assert out.shape == (B, n_out)
    assert jnp.allclose(out, ref_forward(x2, w2, b2), atol=1e-2, rtol=1e-2), "tiled mismatch"
    out_na = jax.block_until_ready(linear_block_apply(x2, params2, activation=False))
    assert jnp.allclose(out_na, x2 @ w2.T + b2, atol=1e-2, rtol=1e-2), "no-act mismatch"

    # --- Test 3: unaligned B / K / N: per-call K zero-pad, padded+sliced N output. ---
    k1, k2, key = jax.random.split(key, 3)
    B, n_in, n_out = 100, 200, 190
    w3, b3 = init_params(k1, n_in, n_out)
    x3 = jax.random.normal(k2, (B, n_in), jnp.float32)
    out = jax.block_until_ready(linear_block_forward(x3, w3, b3, use_pallas=True))
    assert out.shape == (B, n_out)
    assert jnp.allclose(out, ref_forward(x3, w3, b3), atol=1e-2, rtol=1e-2), "odd-shape mismatch"

    # --- Test 4: bf16 operands (f32 accumulation) for the v6e/v7x fast MXU path. ---
    params_bf16 = prepare_linear_block_params(w2, b2, compute_dtype=jnp.bfloat16)
    out = jax.block_until_ready(linear_block_apply(x2, params_bf16))
    assert out.shape == (256, 384) and out.dtype == x2.dtype
    assert jnp.allclose(out, ref_forward(x2, w2, b2), atol=6e-2, rtol=5e-2), "bf16 mismatch"

    # --- Test 5: multiple M tiles with the resident (grid-invariant) weight. ---
    out = jax.block_until_ready(linear_block_apply(x2, params2, tile_m_max=128))
    assert jnp.allclose(out, ref_forward(x2, w2, b2), atol=1e-2, rtol=1e-2), "M-tiled mismatch"

    # --- Test 6: forced K/N streaming (kt>1, nt>1) exercising the accumulator path. ---
    out = jax.block_until_ready(
        linear_block_apply(x2, params2, max_tile_k=128, max_tile_n=128))
    assert jnp.allclose(out, ref_forward(x2, w2, b2), atol=1e-2, rtol=1e-2), "acc-path mismatch"

    print("KERNEL_OK")
</pallas_src>

<mosaic_0001>
module attributes {stable_mosaic.version = 11 : i64} {
  func.func @_linear_block_kernel(%arg0: i32, %arg1: i32, %arg2: i32, %arg3: memref<8x128xf32, #tpu.memory_space<vmem>>, %arg4: memref<128x128xf32, #tpu.memory_space<vmem>>, %arg5: memref<1x128xf32, #tpu.memory_space<vmem>>, %arg6: memref<8x128xf32, #tpu.memory_space<vmem>>) attributes {dimension_semantics = [#tpu.dimension_semantics<parallel>, #tpu.dimension_semantics<parallel>, #tpu.dimension_semantics<arbitrary>], iteration_bounds = array<i64: 1, 1, 1>, scalar_prefetch = 0 : i64, scratch_operands = 0 : i64, tpu.core_type = #tpu.core_type<tc>, window_params = [{transform_indices = @transform_0, window_bounds = array<i64: 8, 128>}, {pipeline_mode = #tpu.pipeline_mode<synchronous>, transform_indices = @transform_1, window_bounds = array<i64: 128, 128>}, {pipeline_mode = #tpu.pipeline_mode<synchronous>, transform_indices = @transform_2, window_bounds = array<i64: 1, 128>}, {transform_indices = @transform_3, window_bounds = array<i64: 8, 128>}]} {
    %c0 = arith.constant 0 : index
    %c0_0 = arith.constant 0 : index
    %0 = vector.load %arg3[%c0, %c0_0] : memref<8x128xf32, #tpu.memory_space<vmem>>, vector<8x128xf32>
    %c0_1 = arith.constant 0 : index
    %c0_2 = arith.constant 0 : index
    %1 = vector.load %arg4[%c0_1, %c0_2] : memref<128x128xf32, #tpu.memory_space<vmem>>, vector<128x128xf32>
    %cst = arith.constant dense<0.000000e+00> : vector<8x128xf32>
    %2 = tpu.matmul %0, %1, %cst {dimension_numbers = #tpu.dot_dimension_numbers<[1], [0], [0], [1], [0, 0, 1, 1], [], []>} : vector<8x128xf32>, vector<128x128xf32>, vector<8x128xf32> -> vector<8x128xf32>
    %c0_3 = arith.constant 0 : index
    %c0_4 = arith.constant 0 : index
    %3 = vector.load %arg5[%c0_3, %c0_4] : memref<1x128xf32, #tpu.memory_space<vmem>>, vector<1x128xf32>
    %4 = vector.broadcast %3 : vector<1x128xf32> to vector<8x128xf32>
    %5 = arith.addf %2, %4 : vector<8x128xf32>
    %cst_5 = arith.constant 0.000000e+00 : f32
    %6 = vector.broadcast %cst_5 : f32 to vector<8x128xf32>
    %7 = arith.maximumf %5, %6 : vector<8x128xf32>
    %c0_6 = arith.constant 0 : index
    %c0_7 = arith.constant 0 : index
    %8 = vector.load %arg6[%c0_6, %c0_7] : memref<8x128xf32, #tpu.memory_space<vmem>>, vector<8x128xf32>
    tpu.vector_store %arg6[%c0_6, %c0_7], %7 {strides = array<i32>} : memref<8x128xf32, #tpu.memory_space<vmem>>, vector<8x128xf32>,
    return
  }
  func.func @transform_0(%arg0: i32, %arg1: i32, %arg2: i32) -> (i32, i32) {
    %c0_i32 = arith.constant 0 : i32
    return %arg0, %arg2 : i32, i32
  }
  func.func @transform_1(%arg0: i32, %arg1: i32, %arg2: i32) -> (i32, i32) {
    %c0_i32 = arith.constant 0 : i32
    %c0_i32_0 = arith.constant 0 : i32
    %c0_i32_1 = arith.constant 0 : i32
    return %c0_i32, %c0_i32_0 : i32, i32
  }
  func.func @transform_2(%arg0: i32, %arg1: i32, %arg2: i32) -> (i32, i32) {
    %c0_i32 = arith.constant 0 : i32
    %c0_i32_0 = arith.constant 0 : i32
    %c0_i32_1 = arith.constant 0 : i32
    return %c0_i32, %c0_i32_0 : i32, i32
  }
  func.func @transform_3(%arg0: i32, %arg1: i32, %arg2: i32) -> (i32, i32) {
    %c0_i32 = arith.constant 0 : i32
    return %arg0, %arg1 : i32, i32
  }
}

</mosaic_0001>

<bundles_post_ra>
// kernel: tpu_custom_call.1
= control target key start
LH: loop header
LB: loop body
LE: loop exit
PB: predicated region body
PF: predicated region fallthrough
CT: control target
= control target key end

     0   :  { %8 = vsyncpa [#allocation3], 0  ;;  %s227_s0 = inlined_call_operand.hbm [shape: f32[8,128], index: 0, kind: input, shape index: {}]   ;;  %s228_s1 = inlined_call_operand.hbm [shape: f32[128,128], index: 1, kind: input, shape index: {}]   ;;  %s229_s2 = inlined_call_operand.vmem [shape: f32[1,128], index: 2, kind: input, shape index: {}]   ;;  %s230_s3 = inlined_call_operand.hbm [shape: f32[8,128], index: 3, kind: output, shape index: {}]  }
   0x1   :  { %9 = vsyncpa [#allocation6], 0 }
   0x2   :  { %10 = vsyncpa [#allocation4], 0  ;;  %s16_s14 = sshll.u32 %s227_s0, 4  ;;  %s190_s15 = smov [#allocation2]   ;;  %s17_s14 = int_to_ptr.hbm [resolvable:$true] %s16_s14 }
   0x3   :  { %s18_s16 = sshll.u32 %s190_s15, 4  ;;  %s26_s19 = sshll.u32 %s228_s1, 4  ;;  %s19_s16 = int_to_ptr.vmem [resolvable:$true] %s18_s16  ;;  %s27_s19 = int_to_ptr.hbm [resolvable:$true] %s26_s19 }
   0x4   :  { %21 = dma.hbm_to_vmem [thread:$0]  %s17_s14, 128, %s19_s16, [#allocation3]  }
   0x5   :  { %s191_s20 = smov [#allocation5]   ;;  %s192_s22 = smov 128  }
   0x6   :  { %s28_s21 = sshll.u32 %s191_s20, 4  ;;  %s193_s23 = smov 8   ;;  %s29_s21 = int_to_ptr.vmem [resolvable:$true] %s28_s21 }
   0x7   :  { %34 = dma.hbm_to_vmem [thread:$0]  %s27_s19, 2048, %s29_s21, [#allocation6], %s192_s22, %s192_s22, %s193_s23  }
   0x8   :  { %184 = dma.done.wait [#allocation3], 128  }
   0x9   :  { %185 = vsyncadd [#allocation3], 4294967168 }
   0xa   :  { %186 = dma.done.wait [#allocation6], 2048  }
   0xb   :  { %187 = vsyncadd [#allocation6], 4294965248  ;;  %v61_v0 = vld [vmem:[#allocation5 + $0x78] sm:$0xff]  ;;  %v60_v1 = vld [vmem:[#allocation5 + $0x70] sm:$0xff]  ;;  %s194_s24 = smov [#allocation7]   ;;  %s95_s28 = sshll.u32 %s230_s3, 4  ;;  %s96_s28 = int_to_ptr.hbm [resolvable:$true] %s95_s28 }
   0xc   :  { %66 = vmatpush.msra.mxu0 %v61_v0  ;;  %v59_v2 = vld [vmem:[#allocation5 + $0x68] sm:$0xff]  ;;  %v58_v3 = vld [vmem:[#allocation5 + $0x60] sm:$0xff]  ;;  %v57_v4 = vld [vmem:[#allocation5 + $0x58] sm:$0xff]  ;;  %s93_s25 = sshll.u32 %s194_s24, 4  ;;  %s94_s25 = int_to_ptr.vmem [resolvable:$true] %s93_s25 }
   0xd   :  { %v56_v5 = vld [vmem:[#allocation5 + $0x50] sm:$0xff]  ;;  %v55_v6 = vld [vmem:[#allocation5 + $0x48] sm:$0xff]  ;;  %v54_v7 = vld [vmem:[#allocation5 + $0x40] sm:$0xff] }
   0xe   :  { %67 = vmatpush.msra.mxu0 %v60_v1  ;;  %v53_v8 = vld [vmem:[#allocation5 + $0x38] sm:$0xff]  ;;  %v52_v9 = vld [vmem:[#allocation5 + $0x30] sm:$0xff]  ;;  %v51_v10 = vld [vmem:[#allocation5 + $0x28] sm:$0xff] }
   0xf   :  { %v50_v11 = vld [vmem:[#allocation5 + $0x20] sm:$0xff]  ;;  %v49_v12 = vld [vmem:[#allocation5 + $0x18] sm:$0xff]  ;;  %v48_v13 = vld [vmem:[#allocation5 + $0x10] sm:$0xff] }
  0x10   :  { %68 = vmatpush.msra.mxu0 %v59_v2  ;;  %v47_v14 = vld [vmem:[#allocation5 + $0x8] sm:$0xff]  ;;  %v46_v15 = vld [vmem:[#allocation5] sm:$0xff]  ;;  %v45_v16 = vld [vmem:[#allocation2] sm:$0xff] }
  0x11   :  { %v111_v17 = vld [vmem:[%s229_s2] ss:$0 sm:$0xff] }
  0x12   :  { %69 = vmatpush.msra.mxu0 %v58_v3 }
  0x14   :  { %70 = vmatpush.msra.mxu0 %v57_v4 }
  0x16   :  { %71 = vmatpush.msra.mxu0 %v56_v5 }
  0x18   :  { %72 = vmatpush.msra.mxu0 %v55_v6 }
  0x1a   :  { %73 = vmatpush.msra.mxu0 %v54_v7 }
  0x1c   :  { %74 = vmatpush.msra.mxu0 %v53_v8 }
  0x1e   :  { %75 = vmatpush.msra.mxu0 %v52_v9 }
  0x20   :  { %76 = vmatpush.msra.mxu0 %v51_v10 }
  0x22   :  { %77 = vmatpush.msra.mxu0 %v50_v11 }
  0x24   :  { %78 = vmatpush.msra.mxu0 %v49_v12 }
  0x26   :  { %79 = vmatpush.msra.mxu0 %v48_v13 }
  0x28   :  { %80 = vmatpush.msra.mxu0 %v47_v14 }
  0x2a   :  { %81 = vmatpush.msra.mxu0 %v46_v15 }
  0x2b   :  { %82 = vmatmul.f32.vlgmr.msra.gmra.mxu0 %v45_v16 }
  0xa8   :  { %v83_v18 = vpop.f32.mrf.mxu0 }
  0xa9   :  { %v84_v19 = vadd.f32 %v111_v17, %v83_v18 }
  0xab   :  { %v86_v20 = vmax.f32 %v84_v19, 0.0 }
  0xad   :  { %87 = vst [vmem:[#allocation7] sm:$0xff] %v86_v20 }
  0xae   :  { %98 = dma.vmem_to_hbm [thread:$0]  %s94_s25, 128, %s96_s28, [#allocation4]  }
  0xaf   :  { %188 = dma.done.wait [#allocation4], 128  }
  0xb0   :  { %189 = vsyncadd [#allocation4], 4294967168 }
  0xb1   :  { %103 = vsyncpa [#allocation3], 1 }
  0xb2   :  { %104 = vsyncpa [#allocation6], 1 }
  0xb3   :  { %105 = vsyncpa [#allocation4], 1 }

</bundles_post_ra>
